<compile_context>
chip_gen: v6e
topology: v6e:2x2x1
jax: 0.10.0
libtpu: 0.0.40
codegen_flags: <defaults>
</compile_context>

<pallas_src>
import jax
import jax.numpy as jnp
from jax.experimental import pallas as pl
from jax.experimental.pallas import tpu as pltpu


def transition_kernel(x_ref, s_ref, b_ref, w_ref, out_ref):
    # x_ref:   (Rb, 2, Wo, 2*Cin)  packed: [H row pair] x [Wo] x [W col pair * channels]
    # s_ref:   (1, Cin)            folded BN scale  (gamma / sqrt(var + eps))
    # b_ref:   (1, Cin)            folded BN bias   (beta - mean * scale)
    # w_ref:   (Cin, Cout)         1x1 conv weight, bf16
    # out_ref: (Rb * Wo, Cout)     pooled output rows
    Rb, _, Wo, C2 = x_ref.shape
    Cin = C2 // 2

    x = x_ref[...]                                            # (Rb, 2, Wo, 2*Cin) f32
    row_sum = x[:, 0] + x[:, 1]                               # pool over the H pair
    pooled = (row_sum[:, :, :Cin] + row_sum[:, :, Cin:]) * 0.25   # pool over the W pair

    # Eval-mode BatchNorm (folded affine); commutes exactly with the average pool.
    t = pooled * s_ref[...] + b_ref[...]                      # (Rb, Wo, Cin) f32

    # 1x1 conv (bias=False) as a single MXU matmul: bf16 operands, f32 accumulation.
    y = jnp.dot(t.reshape(Rb * Wo, Cin).astype(jnp.bfloat16), w_ref[...],
                preferred_element_type=jnp.float32)           # (Rb*Wo, Cout)

    out_ref[...] = y.astype(out_ref.dtype)


def _pick_block_rows(total_rows, row_bytes, budget_bytes=2 << 20):
    # Largest divisor of total_rows whose input block stays under ~2 MiB.
    for d in range(total_rows, 0, -1):
        if total_rows % d == 0 and d * row_bytes <= budget_bytes:
            return d
    return 1


def transition_pallas(x, scale, bias, w, *, block_rows=None):
    """x: (N, H, W, Cin) f32 NHWC; scale/bias: (Cin,) folded eval-BN; w: (Cin, Cout)."""
    N, H, W, Cin = x.shape
    assert H % 2 == 0 and W % 2 == 0, "AvgPool2d(2, stride=2) expects even spatial dims"
    Ho, Wo = H // 2, W // 2
    Cout = w.shape[1]
    rows = N * Ho

    # Free row-major regrouping: (N, H, W, Cin) -> (N*Ho, 2, Wo, 2*Cin).
    # Output pixel (n, ho, wo)'s 2x2 window is x_packed[n*Ho+ho, 0:2, wo, :Cin]/[Cin:].
    x_packed = x.reshape(rows, 2, Wo, 2 * Cin)

    row_bytes = 2 * Wo * 2 * Cin * x.dtype.itemsize
    if block_rows is None:
        block_rows = _pick_block_rows(rows, row_bytes)
    assert rows % block_rows == 0
    grid = (rows // block_rows,)

    in_block_bytes = block_rows * row_bytes
    out_block_bytes = block_rows * Wo * Cout * 4
    vmem_limit = int(min(max(4 * (in_block_bytes + out_block_bytes) + (1 << 20),
                             16 << 20), 32 << 20))

    s2 = scale.reshape(1, Cin).astype(jnp.float32)
    b2 = bias.reshape(1, Cin).astype(jnp.float32)
    w_bf16 = w.astype(jnp.bfloat16)

    out2d = pl.pallas_call(
        transition_kernel,
        out_shape=jax.ShapeDtypeStruct((rows * Wo, Cout), jnp.float32),
        grid_spec=pltpu.PrefetchScalarGridSpec(
            num_scalar_prefetch=0,
            grid=grid,
            in_specs=[
                pl.BlockSpec((block_rows, 2, Wo, 2 * Cin), lambda i: (i, 0, 0, 0)),
                pl.BlockSpec((1, Cin), lambda i: (0, 0)),
                pl.BlockSpec((1, Cin), lambda i: (0, 0)),
                pl.BlockSpec((Cin, Cout), lambda i: (0, 0)),
            ],
            out_specs=pl.BlockSpec((block_rows * Wo, Cout), lambda i: (i, 0)),
        ),
        compiler_params=pltpu.CompilerParams(
            dimension_semantics=("parallel",),
            vmem_limit_bytes=vmem_limit),
    )(x_packed, s2, b2, w_bf16)

    return out2d.reshape(N, Ho, Wo, Cout)


def transition_reference(x, scale, bias, w):
    # Pure-JAX reference with the literal PyTorch op order: BN (eval) -> 1x1 conv -> AvgPool2d(2,2).
    t = x * scale.reshape(1, 1, 1, -1) + bias.reshape(1, 1, 1, -1)
    t = jnp.einsum('nhwc,cd->nhwd', t, w)
    N, H, W, Cout = t.shape
    return t.reshape(N, H // 2, 2, W // 2, 2, Cout).mean(axis=(2, 4))


def make_params(key, in_channels, out_channels):
    ks = jax.random.split(key, 5)
    eps = 1e-5
    # BatchNorm2d(in_channels), eval mode: fold running stats into scale/bias.
    gamma = jax.random.uniform(ks[0], (in_channels,), jnp.float32, 0.5, 1.5)
    beta = jax.random.normal(ks[1], (in_channels,), jnp.float32) * 0.1
    run_mean = jax.random.normal(ks[2], (in_channels,), jnp.float32) * 0.1
    run_var = jax.random.uniform(ks[3], (in_channels,), jnp.float32, 0.5, 1.5)
    scale = gamma / jnp.sqrt(run_var + eps)
    bias = beta - run_mean * scale
    # Conv2d(in, out, 1, bias=False): torch weight (out, in, 1, 1) -> (in, out).
    w = jax.random.normal(ks[4], (in_channels, out_channels), jnp.float32) * 0.1
    return scale, bias, w


if __name__ == "__main__":
    N, H, W = 2, 16, 16
    in_channels, out_channels = 16, 8   # DenseNet transition halves the channel count

    key = jax.random.PRNGKey(0)
    kx, kp = jax.random.split(key)
    x = jax.random.normal(kx, (N, H, W, in_channels), jnp.float32)  # NHWC

    scale, bias, w = make_params(kp, in_channels, out_channels)

    out = transition_pallas(x, scale, bias, w)
    out = jax.block_until_ready(out)

    ref = transition_reference(x, scale, bias, w)
    assert out.shape == (N, H // 2, W // 2, out_channels), out.shape
    max_err = float(jnp.max(jnp.abs(out - ref)))
    # bf16 matmul operands (f32 accumulation) vs f32 reference -> relaxed tolerance.
    assert max_err < 2e-2, max_err

    print("KERNEL_OK")
</pallas_src>

<mosaic_0001>
module attributes {stable_mosaic.version = 11 : i64} {
  func.func @transition_kernel(%arg0: i32, %arg1: memref<16x2x8x32xf32, #tpu.memory_space<vmem>>, %arg2: memref<1x16xf32, #tpu.memory_space<vmem>>, %arg3: memref<1x16xf32, #tpu.memory_space<vmem>>, %arg4: memref<16x8xbf16, #tpu.memory_space<vmem>>, %arg5: memref<128x8xf32, #tpu.memory_space<vmem>>) attributes {dimension_semantics = [#tpu.dimension_semantics<parallel>], iteration_bounds = array<i64: 1>, scalar_prefetch = 0 : i64, scratch_operands = 0 : i64, tpu.core_type = #tpu.core_type<tc>, window_params = [{transform_indices = @transform_0, window_bounds = array<i64: 16, 2, 8, 32>}, {pipeline_mode = #tpu.pipeline_mode<synchronous>, transform_indices = @transform_1, window_bounds = array<i64: 1, 16>}, {pipeline_mode = #tpu.pipeline_mode<synchronous>, transform_indices = @transform_2, window_bounds = array<i64: 1, 16>}, {pipeline_mode = #tpu.pipeline_mode<synchronous>, transform_indices = @transform_3, window_bounds = array<i64: 16, 8>}, {transform_indices = @transform_4, window_bounds = array<i64: 128, 8>}]} {
    %c0 = arith.constant 0 : index
    %c0_0 = arith.constant 0 : index
    %c0_1 = arith.constant 0 : index
    %c0_2 = arith.constant 0 : index
    %0 = vector.load %arg1[%c0, %c0_0, %c0_1, %c0_2] : memref<16x2x8x32xf32, #tpu.memory_space<vmem>>, vector<16x2x8x32xf32>
    %1 = vector.extract_strided_slice %0 {offsets = [0, 0, 0, 0], sizes = [16, 1, 8, 32], strides = [1, 1, 1, 1]} : vector<16x2x8x32xf32> to vector<16x1x8x32xf32>
    %2 = vector.shape_cast %1 : vector<16x1x8x32xf32> to vector<16x8x32xf32>
    %3 = vector.extract_strided_slice %0 {offsets = [0, 1, 0, 0], sizes = [16, 1, 8, 32], strides = [1, 1, 1, 1]} : vector<16x2x8x32xf32> to vector<16x1x8x32xf32>
    %4 = vector.shape_cast %3 : vector<16x1x8x32xf32> to vector<16x8x32xf32>
    %5 = arith.addf %2, %4 : vector<16x8x32xf32>
    %6 = vector.extract_strided_slice %5 {offsets = [0, 0, 0], sizes = [16, 8, 16], strides = [1, 1, 1]} : vector<16x8x32xf32> to vector<16x8x16xf32>
    %7 = vector.extract_strided_slice %5 {offsets = [0, 0, 16], sizes = [16, 8, 16], strides = [1, 1, 1]} : vector<16x8x32xf32> to vector<16x8x16xf32>
    %8 = arith.addf %6, %7 : vector<16x8x16xf32>
    %cst = arith.constant 2.500000e-01 : f32
    %9 = vector.broadcast %cst : f32 to vector<16x8x16xf32>
    %10 = arith.mulf %8, %9 : vector<16x8x16xf32>
    %c0_3 = arith.constant 0 : index
    %c0_4 = arith.constant 0 : index
    %11 = vector.load %arg2[%c0_3, %c0_4] : memref<1x16xf32, #tpu.memory_space<vmem>>, vector<1x16xf32>
    %12 = vector.shape_cast %11 : vector<1x16xf32> to vector<1x1x16xf32>
    %13 = vector.broadcast %12 : vector<1x1x16xf32> to vector<16x8x16xf32>
    %14 = arith.mulf %10, %13 : vector<16x8x16xf32>
    %c0_5 = arith.constant 0 : index
    %c0_6 = arith.constant 0 : index
    %15 = vector.load %arg3[%c0_5, %c0_6] : memref<1x16xf32, #tpu.memory_space<vmem>>, vector<1x16xf32>
    %16 = vector.shape_cast %15 : vector<1x16xf32> to vector<1x1x16xf32>
    %17 = vector.broadcast %16 : vector<1x1x16xf32> to vector<16x8x16xf32>
    %18 = arith.addf %14, %17 : vector<16x8x16xf32>
    %19 = vector.shape_cast %18 : vector<16x8x16xf32> to vector<128x16xf32>
    %20 = arith.truncf %19 : vector<128x16xf32> to vector<128x16xbf16>
    %c0_7 = arith.constant 0 : index
    %c0_8 = arith.constant 0 : index
    %21 = vector.load %arg4[%c0_7, %c0_8] : memref<16x8xbf16, #tpu.memory_space<vmem>>, vector<16x8xbf16>
    %cst_9 = arith.constant dense<0.000000e+00> : vector<128x8xf32>
    %22 = tpu.matmul %20, %21, %cst_9 {dimension_numbers = #tpu.dot_dimension_numbers<[1], [0], [0], [1], [0, 0, 1, 1], [], []>} : vector<128x16xbf16>, vector<16x8xbf16>, vector<128x8xf32> -> vector<128x8xf32>
    %c0_10 = arith.constant 0 : index
    %c0_11 = arith.constant 0 : index
    %23 = vector.load %arg5[%c0_10, %c0_11] : memref<128x8xf32, #tpu.memory_space<vmem>>, vector<128x8xf32>
    tpu.vector_store %arg5[%c0_10, %c0_11], %22 {strides = array<i32>} : memref<128x8xf32, #tpu.memory_space<vmem>>, vector<128x8xf32>,
    return
  }
  func.func @transform_0(%arg0: i32) -> (i32, i32, i32, i32) {
    %c0_i32 = arith.constant 0 : i32
    %c0_i32_0 = arith.constant 0 : i32
    %c0_i32_1 = arith.constant 0 : i32
    %c0_i32_2 = arith.constant 0 : i32
    return %arg0, %c0_i32, %c0_i32_0, %c0_i32_1 : i32, i32, i32, i32
  }
  func.func @transform_1(%arg0: i32) -> (i32, i32) {
    %c0_i32 = arith.constant 0 : i32
    %c0_i32_0 = arith.constant 0 : i32
    %c0_i32_1 = arith.constant 0 : i32
    return %c0_i32, %c0_i32_0 : i32, i32
  }
  func.func @transform_2(%arg0: i32) -> (i32, i32) {
    %c0_i32 = arith.constant 0 : i32
    %c0_i32_0 = arith.constant 0 : i32
    %c0_i32_1 = arith.constant 0 : i32
    return %c0_i32, %c0_i32_0 : i32, i32
  }
  func.func @transform_3(%arg0: i32) -> (i32, i32) {
    %c0_i32 = arith.constant 0 : i32
    %c0_i32_0 = arith.constant 0 : i32
    %c0_i32_1 = arith.constant 0 : i32
    return %c0_i32, %c0_i32_0 : i32, i32
  }
  func.func @transform_4(%arg0: i32) -> (i32, i32) {
    %c0_i32 = arith.constant 0 : i32
    %c0_i32_0 = arith.constant 0 : i32
    return %arg0, %c0_i32 : i32, i32
  }
}

</mosaic_0001>

<bundles_post_ra>
// kernel: tpu_custom_call.1
= control target key start
LH: loop header
LB: loop body
LE: loop exit
PB: predicated region body
PF: predicated region fallthrough
CT: control target
= control target key end

     0   :  { %9 = vsyncpa [#allocation3], 0  ;;  %s449_s15 = smov [#allocation2]   ;;  %s678_s0 = inlined_call_operand.hbm [shape: f32[16,2,8,32], index: 0, kind: input, shape index: {}]   ;;  %s679_s1 = inlined_call_operand.vmem [shape: f32[1,16], index: 1, kind: input, shape index: {}]   ;;  %s680_s2 = inlined_call_operand.vmem [shape: f32[1,16], index: 2, kind: input, shape index: {}]   ;;  %s681_s3 = inlined_call_operand.vmem [shape: bf16[16,8], index: 3, kind: input, shape index: {}]   ;;  %s682_s4 = inlined_call_operand.vmem [shape: f32[128,8], index: 4, kind: output, shape index: {}]  }
   0x1   :  { %s15_s16 = sshll.u32 %s449_s15, 4  ;;  %s16_s16 = int_to_ptr.vmem [resolvable:$true] %s15_s16 }
   0x2   :  { %s435_s17 = scalar_lea.vmem %s16_s16, 4096  ;;  %p440_p1 = scmp.lt.s32.totalorder %s16_s16, %s16_s16 }
   0x3   :  { %p436_p0 = scmp.ne.s32.totalorder %s16_s16, %s435_s17  ;;  %p441_p2 = scmp.lt.s32.totalorder %s435_s17, %s435_s17 }
   0x5   :  { %p442_p3 = por %p441_p2, %p440_p1 }
   0x7   :  { %p443_p4 = pnand %p442_p3, %p436_p0 }
   0x9   :  { %446 = shalt.err (!%p443_p4)
}
   0xa   :  { %s450_s18 = smov 128   ;;  %s451_s19 = smov 8  }
   0xb   :  { %21 = dma.hbm_to_vmem [thread:$0]  %s678_s0, 4096, %s16_s16, [#allocation3], %s450_s18, %s450_s18, %s451_s19  }
   0xc   :  { %447 = dma.done.wait [#allocation3], 4096  }
   0xd   :  { %448 = vsyncadd [#allocation3], 4294963200  ;;  %v48_v0 = vld [vmem:[#allocation2 + $0x80] sm:$0xff]  ;;  %v49_v1 = vld [vmem:[#allocation2 + $0x88] sm:$0xff]  ;;  %s452_s22 = smov 112   ;;  %vm238_vm0 = vcmask 130048  }
   0xe   :  { %v32_v2 = vld [vmem:[#allocation2] sm:$0xff]  ;;  %v481_v3 = vadd.f32 %v49_v1, %v48_v0  ;;  %v33_v4 = vld [vmem:[#allocation2 + $0x8] sm:$0xff]  ;;  %v50_v5 = vld [vmem:[#allocation2 + $0x90] sm:$0xff]  ;;  %vm360_vm1 = vcmask 64512  }
   0xf   :  { %v51_v6 = vld [vmem:[#allocation2 + $0x98] sm:$0xff]  ;;  %v483_v7 = vadd.f32 %v33_v4, %v32_v2  ;;  %v34_v8 = vld [vmem:[#allocation2 + $0x10] sm:$0xff]  ;;  %v36_v14 = vld [vmem:[#allocation2 + $0x20] sm:$0xff] }
  0x10   :  { %v35_v9 = vld [vmem:[#allocation2 + $0x18] sm:$0xff]  ;;  %112 = vrot.lane.b32.xlu1 %v481_v3, %s452_s22  ;;  %v487_v10 = vadd.f32 %v51_v6, %v50_v5  ;;  %v38_v12 = vld [vmem:[#allocation2 + $0x30] sm:$0xff]  ;;  %v37_v15 = vld [vmem:[#allocation2 + $0x28] sm:$0xff] }
  0x11   :  { %96 = vrot.lane.b32.xlu0 %v483_v7, %s452_s22  ;;  %v491_v11 = vadd.f32 %v35_v9, %v34_v8  ;;  %v39_v13 = vld [vmem:[#allocation2 + $0x38] sm:$0xff]  ;;  %v499_v17 = vadd.f32 %v37_v15, %v36_v14  ;;  %v54_v18 = vld [vmem:[#allocation2 + $0xb0] sm:$0xff]  ;;  %v52_v20 = vld [vmem:[#allocation2 + $0xa0] sm:$0xff] }
  0x12   :  { %v495_v16 = vadd.f32 %v39_v13, %v38_v12  ;;  %v55_v19 = vld [vmem:[#allocation2 + $0xb8] sm:$0xff]  ;;  %v53_v21 = vld [vmem:[#allocation2 + $0xa8] sm:$0xff]  ;;  %v42_v24 = vld [vmem:[#allocation2 + $0x50] sm:$0xff] }
  0x13   :  { %v503_v22 = vadd.f32 %v55_v19, %v54_v18  ;;  %v507_v23 = vadd.f32 %v53_v21, %v52_v20  ;;  %v43_v25 = vld [vmem:[#allocation2 + $0x58] sm:$0xff]  ;;  %v426_v26 = vld [vmem:[%s681_s3] sm:$0xff]   ;;  %v41_v28 = vld [vmem:[#allocation2 + $0x48] sm:$0xff] }
  0x14   :  { %114 = vrot.lane.b32.xlu1 %v487_v10, %s452_s22  ;;  %v40_v27 = vld [vmem:[#allocation2 + $0x40] sm:$0xff]  ;;  %402 = vmatprep.subr.bf16.mxu0 %v426_v26  ;;  %v514_v29 = vadd.f32 %v43_v25, %v42_v24  ;;  %v58_v31 = vld [vmem:[#allocation2 + $0xd0] sm:$0xff]  ;;  %v59_v32 = vld [vmem:[#allocation2 + $0xd8] sm:$0xff] }
  0x15   :  { %98 = vrot.lane.b32.xlu0 %v491_v11, %s452_s22  ;;  %420 = vmatprep.subr.bf16.mxu1 %v426_v26  ;;  %v518_v30 = vadd.f32 %v41_v28, %v40_v27  ;;  %v56_v33 = vld [vmem:[#allocation2 + $0xc0] sm:$0xff]  ;;  %v57_v34 = vld [vmem:[#allocation2 + $0xc8] sm:$0xff]  ;;  %v522_v35 = vadd.f32 %v59_v32, %v58_v31  ;;  %v46_v37 = vld [vmem:[#allocation2 + $0x70] sm:$0xff] }
  0x16   :  { %403 = vmatpush3.bf16.msra.mxu0 %v426_v26  ;;  %421 = vmatpush3.bf16.msra.mxu1 %v426_v26  ;;  %v526_v36 = vadd.f32 %v57_v34, %v56_v33  ;;  %v47_v38 = vld [vmem:[#allocation2 + $0x78] sm:$0xff]  ;;  %v44_v39 = vld [vmem:[#allocation2 + $0x60] sm:$0xff]  ;;  %v45_v40 = vld [vmem:[#allocation2 + $0x68] sm:$0xff] }
  0x17   :  { %v530_v41 = vadd.f32 %v47_v38, %v46_v37  ;;  %v534_v42 = vadd.f32 %v45_v40, %v44_v39  ;;  %v62_v43 = vld [vmem:[#allocation2 + $0xf0] sm:$0xff]  ;;  %v63_v44 = vld [vmem:[#allocation2 + $0xf8] sm:$0xff]  ;;  %v60_v45 = vld [vmem:[#allocation2 + $0xe0] sm:$0xff] }
  0x18   :  { %102 = vrot.lane.b32.xlu1 %v495_v16, %s452_s22  ;;  %v61_v46 = vld [vmem:[#allocation2 + $0xe8] sm:$0xff]  ;;  %v538_v47 = vadd.f32 %v63_v44, %v62_v43  ;;  %v553_v54 = vld [vmem:[%s679_s1] ss:$0 sm:$0xff] }
  0x19   :  { %100 = vrot.lane.b32.xlu0 %v499_v17, %s452_s22  ;;  %v542_v48 = vadd.f32 %v61_v46, %v60_v45  ;;  %v562_v0 = vld [vmem:[%s680_s2] ss:$0 sm:$0xff] }
  0x1c   :  { %118 = vrot.lane.b32.xlu1 %v503_v22, %s452_s22 }
  0x1d   :  { %116 = vrot.lane.b32.xlu0 %v507_v23, %s452_s22 }
  0x20   :  { %106 = vrot.lane.b32.xlu1 %v514_v29, %s452_s22 }
  0x21   :  { %104 = vrot.lane.b32.xlu0 %v518_v30, %s452_s22 }
  0x24   :  { %122 = vrot.lane.b32.xlu1 %v522_v35, %s452_s22 }
  0x25   :  { %120 = vrot.lane.b32.xlu0 %v526_v36, %s452_s22 }
  0x28   :  { %110 = vrot.lane.b32.xlu1 %v530_v41, %s452_s22 }
  0x29   :  { %108 = vrot.lane.b32.xlu0 %v534_v42, %s452_s22 }
  0x2c   :  { %126 = vrot.lane.b32.xlu1 %v538_v47, %s452_s22 }
  0x2d   :  { %124 = vrot.lane.b32.xlu0 %v542_v48, %s452_s22 }
  0x82   :  { %v113_v49 = vpop.permute.xlu1 %112 }
  0x83   :  { %v152_v50 = vadd.f32 %v113_v49, %v481_v3  ;;  %v97_v51 = vpop.permute.xlu0 %96 }
  0x84   :  { %v144_v52 = vadd.f32 %v97_v51, %v483_v7 }
  0x85   :  { %v168_v53 = vmul.f32 0.25, %v152_v50 }
  0x86   :  { %v160_v55 = vmul.f32 0.25, %v144_v52  ;;  %v115_v56 = vpop.permute.xlu1 %114 }
  0x87   :  { %v153_v57 = vadd.f32 %v115_v56, %v487_v10  ;;  %v99_v58 = vpop.permute.xlu0 %98  ;;  %v191_v60 = vmul.f32 %v553_v54, %v168_v53 }
  0x88   :  { %v145_v59 = vadd.f32 %v99_v58, %v491_v11  ;;  %v183_v62 = vmul.f32 %v553_v54, %v160_v55 }
  0x89   :  { %v169_v61 = vmul.f32 0.25, %v153_v57  ;;  %v214_v8 = vadd.f32 %v562_v0, %v191_v60 }
  0x8a   :  { %v161_v63 = vmul.f32 0.25, %v145_v59  ;;  %v103_v1 = vpop.permute.xlu1 %102  ;;  %v206_v12 = vadd.f32 %v562_v0, %v183_v62 }
  0x8b   :  { %v192_v2 = vmul.f32 %v553_v54, %v169_v61  ;;  %v147_v3 = vadd.f32 %v103_v1, %v495_v16  ;;  %v101_v4 = vpop.permute.xlu0 %100 }
  0x8c   :  { %v184_v5 = vmul.f32 %v553_v54, %v161_v63  ;;  %v146_v6 = vadd.f32 %v101_v4, %v499_v17 }
  0x8d   :  { %v163_v7 = vmul.f32 0.25, %v147_v3  ;;  %v215_v9 = vadd.f32 %v562_v0, %v192_v2 }
  0x8e   :  { %v162_v10 = vmul.f32 0.25, %v146_v6  ;;  %v119_v11 = vpop.permute.xlu1 %118  ;;  %v207_v13 = vadd.f32 %v562_v0, %v184_v5 }
  0x8f   :  { %v186_v14 = vmul.f32 %v553_v54, %v163_v7  ;;  %v155_v15 = vadd.f32 %v119_v11, %v503_v22  ;;  %v117_v16 = vpop.permute.xlu0 %116  ;;  %v226_v18 = vpack.c.bf16 %v215_v9, %v214_v8 }
  0x90   :  { %v185_v17 = vmul.f32 %v553_v54, %v162_v10  ;;  %v154_v19 = vadd.f32 %v117_v16, %v507_v23  ;;  %v222_v20 = vpack.c.bf16 %v207_v13, %v206_v12 }
  0x91   :  { %v209_v21 = vadd.f32 %v562_v0, %v186_v14  ;;  %v171_v24 = vmul.f32 0.25, %v155_v15  ;;  %412 = vmatprep.mubr.msk.bf16.mxu1 %vm238_vm0, %v226_v18 }
  0x92   :  { %v208_v25 = vadd.f32 %v562_v0, %v185_v17  ;;  %v170_v26 = vmul.f32 0.25, %v154_v19  ;;  %404 = vmatprep.mubr.msk.bf16.mxu0 %vm238_vm0, %v222_v20  ;;  %v107_v27 = vpop.permute.xlu1 %106 }
  0x93   :  { %v194_v22 = vmul.f32 %v553_v54, %v171_v24  ;;  %v149_v28 = vadd.f32 %v107_v27, %v514_v29  ;;  %v105_v31 = vpop.permute.xlu0 %104 }
  0x94   :  { %v223_v32 = vpack.c.bf16 %v209_v21, %v208_v25  ;;  %v193_v23 = vmul.f32 %v553_v54, %v170_v26  ;;  %v148_v33 = vadd.f32 %v105_v31, %v518_v30 }
  0x95   :  { %v217_v34 = vadd.f32 %v562_v0, %v194_v22  ;;  %v165_v37 = vmul.f32 0.25, %v149_v28 }
  0x96   :  { %v216_v38 = vadd.f32 %v562_v0, %v193_v23  ;;  %v164_v39 = vmul.f32 0.25, %v148_v33  ;;  %405 = vmatmul.mubr.msk.bf16.vlgmr.msra.gmra.mxu0 %vm238_vm0, %v223_v32  ;;  %v123_v40 = vpop.permute.xlu1 %122 }
  0x97   :  { %v188_v43 = vmul.f32 %v553_v54, %v165_v37  ;;  %v157_v44 = vadd.f32 %v123_v40, %v522_v35  ;;  %v121_v29 = vpop.permute.xlu0 %120 }
  0x98   :  { %v227_v45 = vpack.c.bf16 %v217_v34, %v216_v38  ;;  %v187_v46 = vmul.f32 %v553_v54, %v164_v39  ;;  %v156_v49 = vadd.f32 %v121_v29, %v526_v36 }
  0x99   :  { %v211_v30 = vadd.f32 %v562_v0, %v188_v43  ;;  %v173_v50 = vmul.f32 0.25, %v157_v44 }
  0x9a   :  { %v210_v51 = vadd.f32 %v562_v0, %v187_v46  ;;  %v172_v52 = vmul.f32 0.25, %v156_v49  ;;  %413 = vmatmul.mubr.msk.bf16.vlgmr.msra.gmra.mxu1 %vm238_vm0, %v227_v45  ;;  %v111_v53 = vpop.permute.xlu1 %110 }
  0x9b   :  { %v196_v55 = vmul.f32 %v553_v54, %v173_v50  ;;  %v151_v56 = vadd.f32 %v111_v53, %v530_v41  ;;  %v109_v35 = vpop.permute.xlu0 %108 }
  0x9c   :  { %v224_v57 = vpack.c.bf16 %v211_v30, %v210_v51  ;;  %v195_v58 = vmul.f32 %v553_v54, %v172_v52  ;;  %v150_v59 = vadd.f32 %v109_v35, %v534_v42 }
  0x9d   :  { %v219_v36 = vadd.f32 %v562_v0, %v196_v55  ;;  %v167_v60 = vmul.f32 0.25, %v151_v56 }
  0x9e   :  { %v218_v61 = vadd.f32 %v562_v0, %v195_v58  ;;  %v166_v62 = vmul.f32 0.25, %v150_v59  ;;  %408 = vmatprep.mubr.msk.bf16.mxu0 %vm238_vm0, %v224_v57  ;;  %v127_v63 = vpop.permute.xlu1 %126 }
  0x9f   :  { %v190_v1 = vmul.f32 %v553_v54, %v167_v60  ;;  %v159_v2 = vadd.f32 %v127_v63, %v538_v47  ;;  %v125_v41 = vpop.permute.xlu0 %124 }
  0xa0   :  { %v228_v3 = vpack.c.bf16 %v219_v36, %v218_v61  ;;  %v189_v4 = vmul.f32 %v553_v54, %v166_v62  ;;  %v158_v5 = vadd.f32 %v125_v41, %v542_v48 }
  0xa1   :  { %v213_v42 = vadd.f32 %v562_v0, %v190_v1  ;;  %v175_v6 = vmul.f32 0.25, %v159_v2 }
  0xa2   :  { %v212_v7 = vadd.f32 %v562_v0, %v189_v4  ;;  %v174_v8 = vmul.f32 0.25, %v158_v5  ;;  %416 = vmatprep.mubr.msk.bf16.mxu1 %vm238_vm0, %v228_v3 }
  0xa3   :  { %v198_v9 = vmul.f32 %v553_v54, %v175_v6 }
  0xa4   :  { %v225_v10 = vpack.c.bf16 %v213_v42, %v212_v7  ;;  %v197_v11 = vmul.f32 %v553_v54, %v174_v8 }
  0xa5   :  { %v221_v47 = vadd.f32 %v562_v0, %v198_v9 }
  0xa6   :  { %v220_v12 = vadd.f32 %v562_v0, %v197_v11  ;;  %409 = vmatmul.mubr.msk.bf16.gmra.mxu0 %vm238_vm0, %v225_v10 }
  0xa8   :  { %v229_v48 = vpack.c.bf16 %v221_v47, %v220_v12 }
  0xaa   :  { %417 = vmatmul.mubr.msk.bf16.gmra.mxu1 %vm238_vm0, %v229_v48 }
 0x156   :  { %v406_v13 = vpop.f32.mrf.mxu0 }
 0x157   :  { %363 = vst.msk [vmem:[%s682_s4 + $0x10] sm:$0xff] %vm360_vm1, %v406_v13 }
 0x158   :  { %v297_v14 = vpop.f32.mrf.mxu0 }
 0x159   :  { %361 = vst.msk [vmem:[%s682_s4] sm:$0xff] %vm360_vm1, %v297_v14 }
 0x15a   :  { %v407_v54 = vpop.f32.mrf.mxu0  ;;  %v414_v0 = vpop.f32.mrf.mxu1 }
 0x15b   :  { %364 = vst.msk [vmem:[%s682_s4 + $0x18] sm:$0xff] %vm360_vm1, %v407_v54  ;;  %371 = vst.msk [vmem:[%s682_s4 + $0x50] sm:$0xff] %vm360_vm1, %v414_v0 }
 0x15c   :  { %v300_v15 = vpop.f32.mrf.mxu0  ;;  %v329_v16 = vpop.f32.mrf.mxu1 }
 0x15d   :  { %362 = vst.msk [vmem:[%s682_s4 + $0x8] sm:$0xff] %vm360_vm1, %v300_v15  ;;  %369 = vst.msk [vmem:[%s682_s4 + $0x40] sm:$0xff] %vm360_vm1, %v329_v16 }
 0x15e   :  { %v415_v18 = vpop.f32.mrf.mxu1 }
 0x15f   :  { %372 = vst.msk [vmem:[%s682_s4 + $0x58] sm:$0xff] %vm360_vm1, %v415_v18 }
 0x160   :  { %v332_v17 = vpop.f32.mrf.mxu1 }
 0x161   :  { %370 = vst.msk [vmem:[%s682_s4 + $0x48] sm:$0xff] %vm360_vm1, %v332_v17 }
 0x166   :  { %v410_v19 = vpop.f32.mrf.mxu0 }
 0x167   :  { %367 = vst.msk [vmem:[%s682_s4 + $0x30] sm:$0xff] %vm360_vm1, %v410_v19 }
 0x168   :  { %v313_v20 = vpop.f32.mrf.mxu0 }
 0x169   :  { %365 = vst.msk [vmem:[%s682_s4 + $0x20] sm:$0xff] %vm360_vm1, %v313_v20 }
 0x16a   :  { %v411_v21 = vpop.f32.mrf.mxu0  ;;  %v418_v24 = vpop.f32.mrf.mxu1 }
 0x16b   :  { %368 = vst.msk [vmem:[%s682_s4 + $0x38] sm:$0xff] %vm360_vm1, %v411_v21  ;;  %375 = vst.msk [vmem:[%s682_s4 + $0x70] sm:$0xff] %vm360_vm1, %v418_v24 }
 0x16c   :  { %v316_v25 = vpop.f32.mrf.mxu0  ;;  %v345_v26 = vpop.f32.mrf.mxu1 }
 0x16d   :  { %366 = vst.msk [vmem:[%s682_s4 + $0x28] sm:$0xff] %vm360_vm1, %v316_v25  ;;  %373 = vst.msk [vmem:[%s682_s4 + $0x60] sm:$0xff] %vm360_vm1, %v345_v26 }
 0x16e   :  { %v419_v27 = vpop.f32.mrf.mxu1 }
 0x16f   :  { %376 = vst.msk [vmem:[%s682_s4 + $0x78] sm:$0xff] %vm360_vm1, %v419_v27 }
 0x170   :  { %v348_v22 = vpop.f32.mrf.mxu1 }
 0x171   :  { %374 = vst.msk [vmem:[%s682_s4 + $0x68] sm:$0xff] %vm360_vm1, %v348_v22 }
 0x172   :  { %381 = vsyncpa [#allocation3], 1 }

</bundles_post_ra>
